<compile_context>
chip_gen: v5e
topology: v5e:2x2
jax: 0.10.0
libtpu: 0.0.40
codegen_flags: <defaults>
</compile_context>

<pallas_src>
import functools

import jax
import jax.numpy as jnp
from jax.experimental import pallas as pl
from jax.experimental.pallas import tpu as pltpu

LANE = 128     # lane (last-dim) granularity
SUBLANE = 8    # f32 sublane granularity


def _round_up(n, m):
    return ((n + m - 1) // m) * m


def _ffnn_fused_kernel(*refs, num_layers):
    """refs = (x_tile, W_0..W_{L-1}, b_0..b_{L-1}, out_tile).

    Weights/biases are full arrays resident in VMEM; x/out are (tm, ·) tiles.
    """
    x_ref = refs[0]
    w_refs = refs[1:1 + num_layers]
    b_refs = refs[1 + num_layers:1 + 2 * num_layers]
    o_ref = refs[1 + 2 * num_layers]

    h = x_ref[...].astype(jnp.float32)
    for i in range(num_layers):  # static unroll (num_layers is a Python int)
        # Feed the MXU operands in the weight dtype (f32 or bf16); accumulate
        # in f32 and keep bias-add / ReLU on the f32 accumulator (v5e-safe).
        lhs = h.astype(w_refs[i].dtype)
        y = b_refs[i][...] + jnp.dot(
            lhs, w_refs[i][...], preferred_element_type=jnp.float32)
        if i != num_layers - 1:
            y = jnp.maximum(y, 0.0)   # ReLU on hidden layers only
        h = y
    o_ref[...] = h.astype(o_ref.dtype)


def prepare_ffnn_params(params, weight_dtype=jnp.float32):
    """One-time (out of hot path) padding/packing of FFNN params.

    Feature dims at every layer boundary are zero-padded to a multiple of 128
    lanes, EXCEPT the very first contraction dim (input_dim), which keeps its
    full extent so the unpadded activation can be fed directly.
    Zero padding is exact: padded W rows/cols are zero, padded bias lanes are
    zero, ReLU(0)=0, and the wrapper slices the result.

    Returns (w_padded_tuple, b_padded_tuple, out_dim).
    """
    in_dim = params[0][0].shape[0]
    dims = [in_dim] + [w.shape[1] for (w, _) in params]
    dims_pad = [in_dim] + [_round_up(d, LANE) for d in dims[1:]]

    w_ps, b_ps = [], []
    for i, (w, b) in enumerate(params):
        kp, np_ = dims_pad[i], dims_pad[i + 1]
        w_p = jnp.zeros((kp, np_), jnp.float32).at[:w.shape[0], :w.shape[1]].set(w)
        w_ps.append(w_p.astype(weight_dtype))
        # Bias stays f32 (added onto the f32 accumulator), pre-shaped [1, N_pad].
        b_ps.append(jnp.zeros((1, np_), jnp.float32).at[0, :b.shape[0]].set(b))
    return tuple(w_ps), tuple(b_ps), dims[-1]


def ffnn_forward(x, w_ps, b_ps, *, out_dim, tm_max=256):
    """Fused FFNN forward: (Linear -> ReLU) * num_hidden, then final Linear.

    x: [batch, input_dim]; w_ps/b_ps from prepare_ffnn_params.
    """
    num_layers = len(w_ps)
    m, k_in = x.shape
    assert k_in == w_ps[0].shape[0]

    # Batch tiling. Only copy we ever make per call is a batch-dim pad of x,
    # and only if batch is not a multiple of the tile.
    tm = min(tm_max, _round_up(m, SUBLANE))
    m_pad = _round_up(m, tm)
    x_p = x if m_pad == m else jnp.zeros((m_pad, k_in), x.dtype).at[:m, :].set(x)

    n_out_pad = w_ps[-1].shape[1]
    grid = (m_pad // tm,)

    # x/out tiled over the batch grid; weights/biases full blocks, block index
    # (0, 0) for every grid step -> VMEM-resident, never re-DMA'd.
    in_specs = [pl.BlockSpec((tm, k_in), lambda i: (i, 0))]
    for w in w_ps:
        in_specs.append(pl.BlockSpec(w.shape, lambda i: (0, 0)))
    for b in b_ps:
        in_specs.append(pl.BlockSpec(b.shape, lambda i: (0, 0)))

    flops = 2 * m_pad * sum(w.shape[0] * w.shape[1] for w in w_ps)
    bytes_accessed = (
        x_p.size * x_p.dtype.itemsize
        + sum(w.size * w.dtype.itemsize for w in w_ps)
        + sum(b.size * b.dtype.itemsize for b in b_ps)
        + m_pad * n_out_pad * x.dtype.itemsize)

    kernel = functools.partial(_ffnn_fused_kernel, num_layers=num_layers)
    out_p = pl.pallas_call(
        kernel,
        out_shape=jax.ShapeDtypeStruct((m_pad, n_out_pad), x.dtype),
        grid=grid,
        in_specs=in_specs,
        out_specs=pl.BlockSpec((tm, n_out_pad), lambda i: (i, 0)),
        compiler_params=pltpu.CompilerParams(
            dimension_semantics=("parallel",),      # shard batch across TCs (v7x)
            vmem_limit_bytes=64 * 1024 * 1024,      # above default, <= v7x physical
        ),
        cost_estimate=pl.CostEstimate(
            flops=flops, transcendentals=0, bytes_accessed=bytes_accessed),
    )(x_p, *w_ps, *b_ps)

    return out_p[:m, :out_dim]


def init_ffnn_params(key, input_dim, hidden_dim, out_dim, num_hidden, bias=True):
    """Deterministic synthetic params matching FFNN.__init__ shapes.

    Returns list of (W [in, out], b [out]) for num_hidden hidden layers plus
    the final output layer. (W stored transposed vs nn.Linear so y = x @ W + b.)
    """
    dim_list = [input_dim] + [hidden_dim] * num_hidden + [out_dim]
    params = []
    for d_in, d_out in zip(dim_list[:-1], dim_list[1:]):
        key, kw, kb = jax.random.split(key, 3)
        bound = 1.0 / jnp.sqrt(jnp.float32(d_in))   # nn.Linear default scale
        w = jax.random.uniform(kw, (d_in, d_out), jnp.float32, -bound, bound)
        if bias:
            b = jax.random.uniform(kb, (d_out,), jnp.float32, -bound, bound)
        else:
            b = jnp.zeros((d_out,), jnp.float32)
        params.append((w, b))
    return params


def ffnn_reference(x, params):
    """Plain-JAX reference for correctness checking."""
    h = x
    for i, (w, b) in enumerate(params):
        h = h @ w + b
        if i != len(params) - 1:
            h = jnp.maximum(h, 0.0)
    return h


if __name__ == "__main__":
    # Small shapes consistent with the module: batch=8, input_dim=32,
    # hidden_dim=64, out_dim=16, num_hidden=2.
    batch, input_dim, hidden_dim, out_dim, num_hidden = 8, 32, 64, 16, 2

    key = jax.random.PRNGKey(0)
    key, kx = jax.random.split(key)
    x = jax.random.normal(kx, (batch, input_dim), jnp.float32)

    params = init_ffnn_params(key, input_dim, hidden_dim, out_dim, num_hidden,
                              bias=True)
    ref = ffnn_reference(x, params)

    # --- f32 weights path (exact) ---
    w_ps, b_ps, n_out = prepare_ffnn_params(params, weight_dtype=jnp.float32)
    fwd = jax.jit(functools.partial(ffnn_forward, out_dim=n_out))
    out = jax.block_until_ready(fwd(x, w_ps, b_ps))
    assert out.shape == (batch, out_dim)
    assert jnp.allclose(out, ref, atol=1e-5, rtol=1e-5)

    # --- bf16 weights path (MXU-peak on v6e/v7x; f32 accumulation) ---
    w_bf, b_bf, _ = prepare_ffnn_params(params, weight_dtype=jnp.bfloat16)
    fwd_bf = jax.jit(functools.partial(ffnn_forward, out_dim=n_out))
    out_bf = jax.block_until_ready(fwd_bf(x, w_bf, b_bf))
    assert out_bf.shape == (batch, out_dim)
    assert jnp.allclose(out_bf, ref, atol=5e-2, rtol=5e-2)

    print("KERNEL_OK")
</pallas_src>

<mosaic_0001>
module attributes {stable_mosaic.version = 11 : i64} {
  func.func @_ffnn_fused_kernel(%arg0: i32, %arg1: memref<8x32xf32, #tpu.memory_space<vmem>>, %arg2: memref<32x128xf32, #tpu.memory_space<vmem>>, %arg3: memref<128x128xf32, #tpu.memory_space<vmem>>, %arg4: memref<128x128xf32, #tpu.memory_space<vmem>>, %arg5: memref<1x128xf32, #tpu.memory_space<vmem>>, %arg6: memref<1x128xf32, #tpu.memory_space<vmem>>, %arg7: memref<1x128xf32, #tpu.memory_space<vmem>>, %arg8: memref<8x128xf32, #tpu.memory_space<vmem>>) attributes {dimension_semantics = [#tpu.dimension_semantics<parallel>], iteration_bounds = array<i64: 1>, scalar_prefetch = 0 : i64, scratch_operands = 0 : i64, tpu.core_type = #tpu.core_type<tc>, window_params = [{transform_indices = @transform_0, window_bounds = array<i64: 8, 32>}, {pipeline_mode = #tpu.pipeline_mode<synchronous>, transform_indices = @transform_1, window_bounds = array<i64: 32, 128>}, {pipeline_mode = #tpu.pipeline_mode<synchronous>, transform_indices = @transform_2, window_bounds = array<i64: 128, 128>}, {pipeline_mode = #tpu.pipeline_mode<synchronous>, transform_indices = @transform_3, window_bounds = array<i64: 128, 128>}, {pipeline_mode = #tpu.pipeline_mode<synchronous>, transform_indices = @transform_4, window_bounds = array<i64: 1, 128>}, {pipeline_mode = #tpu.pipeline_mode<synchronous>, transform_indices = @transform_5, window_bounds = array<i64: 1, 128>}, {pipeline_mode = #tpu.pipeline_mode<synchronous>, transform_indices = @transform_6, window_bounds = array<i64: 1, 128>}, {transform_indices = @transform_7, window_bounds = array<i64: 8, 128>}]} {
    %c0 = arith.constant 0 : index
    %c0_0 = arith.constant 0 : index
    %0 = vector.load %arg1[%c0, %c0_0] : memref<8x32xf32, #tpu.memory_space<vmem>>, vector<8x32xf32>
    %c0_1 = arith.constant 0 : index
    %c0_2 = arith.constant 0 : index
    %1 = vector.load %arg5[%c0_1, %c0_2] : memref<1x128xf32, #tpu.memory_space<vmem>>, vector<1x128xf32>
    %c0_3 = arith.constant 0 : index
    %c0_4 = arith.constant 0 : index
    %2 = vector.load %arg2[%c0_3, %c0_4] : memref<32x128xf32, #tpu.memory_space<vmem>>, vector<32x128xf32>
    %cst = arith.constant dense<0.000000e+00> : vector<8x128xf32>
    %3 = tpu.matmul %0, %2, %cst {dimension_numbers = #tpu.dot_dimension_numbers<[1], [0], [0], [1], [0, 0, 1, 1], [], []>} : vector<8x32xf32>, vector<32x128xf32>, vector<8x128xf32> -> vector<8x128xf32>
    %4 = vector.broadcast %1 : vector<1x128xf32> to vector<8x128xf32>
    %5 = arith.addf %4, %3 : vector<8x128xf32>
    %cst_5 = arith.constant 0.000000e+00 : f32
    %6 = vector.broadcast %cst_5 : f32 to vector<8x128xf32>
    %7 = arith.maximumf %5, %6 : vector<8x128xf32>
    %c0_6 = arith.constant 0 : index
    %c0_7 = arith.constant 0 : index
    %8 = vector.load %arg6[%c0_6, %c0_7] : memref<1x128xf32, #tpu.memory_space<vmem>>, vector<1x128xf32>
    %c0_8 = arith.constant 0 : index
    %c0_9 = arith.constant 0 : index
    %9 = vector.load %arg3[%c0_8, %c0_9] : memref<128x128xf32, #tpu.memory_space<vmem>>, vector<128x128xf32>
    %cst_10 = arith.constant dense<0.000000e+00> : vector<8x128xf32>
    %10 = tpu.matmul %7, %9, %cst_10 {dimension_numbers = #tpu.dot_dimension_numbers<[1], [0], [0], [1], [0, 0, 1, 1], [], []>} : vector<8x128xf32>, vector<128x128xf32>, vector<8x128xf32> -> vector<8x128xf32>
    %11 = vector.broadcast %8 : vector<1x128xf32> to vector<8x128xf32>
    %12 = arith.addf %11, %10 : vector<8x128xf32>
    %cst_11 = arith.constant 0.000000e+00 : f32
    %13 = vector.broadcast %cst_11 : f32 to vector<8x128xf32>
    %14 = arith.maximumf %12, %13 : vector<8x128xf32>
    %c0_12 = arith.constant 0 : index
    %c0_13 = arith.constant 0 : index
    %15 = vector.load %arg7[%c0_12, %c0_13] : memref<1x128xf32, #tpu.memory_space<vmem>>, vector<1x128xf32>
    %c0_14 = arith.constant 0 : index
    %c0_15 = arith.constant 0 : index
    %16 = vector.load %arg4[%c0_14, %c0_15] : memref<128x128xf32, #tpu.memory_space<vmem>>, vector<128x128xf32>
    %cst_16 = arith.constant dense<0.000000e+00> : vector<8x128xf32>
    %17 = tpu.matmul %14, %16, %cst_16 {dimension_numbers = #tpu.dot_dimension_numbers<[1], [0], [0], [1], [0, 0, 1, 1], [], []>} : vector<8x128xf32>, vector<128x128xf32>, vector<8x128xf32> -> vector<8x128xf32>
    %18 = vector.broadcast %15 : vector<1x128xf32> to vector<8x128xf32>
    %19 = arith.addf %18, %17 : vector<8x128xf32>
    %c0_17 = arith.constant 0 : index
    %c0_18 = arith.constant 0 : index
    %20 = vector.load %arg8[%c0_17, %c0_18] : memref<8x128xf32, #tpu.memory_space<vmem>>, vector<8x128xf32>
    tpu.vector_store %arg8[%c0_17, %c0_18], %19 {strides = array<i32>} : memref<8x128xf32, #tpu.memory_space<vmem>>, vector<8x128xf32>,
    return
  }
  func.func @transform_0(%arg0: i32) -> (i32, i32) {
    %c0_i32 = arith.constant 0 : i32
    %c0_i32_0 = arith.constant 0 : i32
    return %arg0, %c0_i32 : i32, i32
  }
  func.func @transform_1(%arg0: i32) -> (i32, i32) {
    %c0_i32 = arith.constant 0 : i32
    %c0_i32_0 = arith.constant 0 : i32
    %c0_i32_1 = arith.constant 0 : i32
    return %c0_i32, %c0_i32_0 : i32, i32
  }
  func.func @transform_2(%arg0: i32) -> (i32, i32) {
    %c0_i32 = arith.constant 0 : i32
    %c0_i32_0 = arith.constant 0 : i32
    %c0_i32_1 = arith.constant 0 : i32
    return %c0_i32, %c0_i32_0 : i32, i32
  }
  func.func @transform_3(%arg0: i32) -> (i32, i32) {
    %c0_i32 = arith.constant 0 : i32
    %c0_i32_0 = arith.constant 0 : i32
    %c0_i32_1 = arith.constant 0 : i32
    return %c0_i32, %c0_i32_0 : i32, i32
  }
  func.func @transform_4(%arg0: i32) -> (i32, i32) {
    %c0_i32 = arith.constant 0 : i32
    %c0_i32_0 = arith.constant 0 : i32
    %c0_i32_1 = arith.constant 0 : i32
    return %c0_i32, %c0_i32_0 : i32, i32
  }
  func.func @transform_5(%arg0: i32) -> (i32, i32) {
    %c0_i32 = arith.constant 0 : i32
    %c0_i32_0 = arith.constant 0 : i32
    %c0_i32_1 = arith.constant 0 : i32
    return %c0_i32, %c0_i32_0 : i32, i32
  }
  func.func @transform_6(%arg0: i32) -> (i32, i32) {
    %c0_i32 = arith.constant 0 : i32
    %c0_i32_0 = arith.constant 0 : i32
    %c0_i32_1 = arith.constant 0 : i32
    return %c0_i32, %c0_i32_0 : i32, i32
  }
  func.func @transform_7(%arg0: i32) -> (i32, i32) {
    %c0_i32 = arith.constant 0 : i32
    %c0_i32_0 = arith.constant 0 : i32
    return %arg0, %c0_i32 : i32, i32
  }
}

</mosaic_0001>

<bundles_post_ra>
// kernel: ffnn_forward.1
= control target key start
LH: loop header
LB: loop body
LE: loop exit
PB: predicated region body
PF: predicated region fallthrough
CT: control target
= control target key end

     0   :  { %12 = vsyncpa [#allocation3], 0  ;;  %s436_s0 = inlined_call_operand.hbm [shape: f32[8,32], index: 0, kind: input, shape index: {}]   ;;  %s437_s1 = inlined_call_operand.hbm [shape: f32[32,128], index: 1, kind: input, shape index: {}]   ;;  %s438_s2 = inlined_call_operand.hbm [shape: f32[128,128], index: 2, kind: input, shape index: {}]   ;;  %s439_s3 = inlined_call_operand.hbm [shape: f32[128,128], index: 3, kind: input, shape index: {}]   ;;  %s440_s4 = inlined_call_operand.vmem [shape: f32[1,128], index: 4, kind: input, shape index: {}]   ;;  %s441_s5 = inlined_call_operand.vmem [shape: f32[1,128], index: 5, kind: input, shape index: {}]   ;;  %s442_s6 = inlined_call_operand.vmem [shape: f32[1,128], index: 6, kind: input, shape index: {}]   ;;  %s443_s7 = inlined_call_operand.hbm [shape: f32[8,128], index: 7, kind: output, shape index: {}]  }
   0x1   :  { %13 = vsyncpa [#allocation6], 0 }
   0x2   :  { %14 = vsyncpa [#allocation9], 0  ;;  %s31_s26 = sshll.u32 %s437_s1, 4  ;;  %s32_s26 = int_to_ptr.hbm [resolvable:$true] %s31_s26 }
   0x3   :  { %15 = vsyncpa [#allocation4], 0  ;;  %s365_s27 = smov [#allocation5]   ;;  %s21_s8 = sshll.u32 %s436_s0, 4  ;;  %s22_s8 = int_to_ptr.hbm [resolvable:$true] %s21_s8 }
   0x4   :  { %s33_s28 = sshll.u32 %s365_s27, 4  ;;  %s366_s9 = smov 128   ;;  %s34_s28 = int_to_ptr.vmem [resolvable:$true] %s33_s28 }
   0x5   :  { %s367_s10 = smov 8   ;;  %s368_s11 = smov [#allocation2]  }
   0x6   :  { %39 = dma.hbm_to_vmem [thread:$0]  %s32_s26, 512, %s34_s28, [#allocation6], %s366_s9, %s366_s9, %s367_s10  }
   0x7   :  { %s23_s12 = sshll.u32 %s368_s11, 4  ;;  %s44_s15 = sshll.u32 %s438_s2, 4  ;;  %s24_s12 = int_to_ptr.vmem [resolvable:$true] %s23_s12  ;;  %s45_s15 = int_to_ptr.hbm [resolvable:$true] %s44_s15 }
   0x8   :  { %26 = dma.hbm_to_vmem [thread:$0]  %s22_s8, 128, %s24_s12, [#allocation3]  }
   0x9   :  { %s57_s17 = sshll.u32 %s439_s3, 4  ;;  %s369_s18 = smov [#allocation7]   ;;  %s58_s17 = int_to_ptr.hbm [resolvable:$true] %s57_s17 }
   0xa   :  { %s46_s19 = sshll.u32 %s369_s18, 4  ;;  %s370_s0 = smov [#allocation8]   ;;  %s47_s19 = int_to_ptr.vmem [resolvable:$true] %s46_s19 }
   0xb   :  { %52 = dma.hbm_to_vmem [thread:$0]  %s45_s15, 2048, %s47_s19, [#allocation6], %s366_s9, %s366_s9, %s367_s10  }
   0xc   :  { %s59_s20 = sshll.u32 %s370_s0, 4  ;;  %s60_s20 = int_to_ptr.vmem [resolvable:$true] %s59_s20 }
   0xd   :  { %65 = dma.hbm_to_vmem [thread:$0]  %s58_s17, 2048, %s60_s20, [#allocation9], %s366_s9, %s366_s9, %s367_s10  }
   0xe   :  { %357 = dma.done.wait [#allocation3], 128  }
   0xf   :  { %358 = vsyncadd [#allocation3], 4294967168 }
  0x10   :  { %359 = dma.done.wait [#allocation6], 2560  }
  0x11   :  { %360 = vsyncadd [#allocation6], 4294964736 }
  0x12   :  { %361 = dma.done.wait [#allocation9], 2048  }
  0x13   :  { %362 = vsyncadd [#allocation9], 4294965248  ;;  %v93_v0 = vld [vmem:[#allocation5 + $0x18] sm:$0xff]  ;;  %v92_v1 = vld [vmem:[#allocation5 + $0x10] sm:$0xff]  ;;  %vm94_vm0 = vcmask 261120   ;;  %s371_s24 = smov [#allocation10]  }
  0x14   :  { %110 = vmatpush.msra.mxu0 %v93_v0  ;;  %v139_v2 = vld [vmem:[#allocation7 + $0x78] sm:$0xff]  ;;  %v91_v3 = vld [vmem:[#allocation5 + $0x8] sm:$0xff]  ;;  %v138_v4 = vld [vmem:[#allocation7 + $0x70] sm:$0xff]  ;;  %s212_s25 = sshll.u32 %s371_s24, 4  ;;  %s214_s28 = sshll.u32 %s443_s7, 4  ;;  %s213_s25 = int_to_ptr.vmem [resolvable:$true] %s212_s25  ;;  %s215_s28 = int_to_ptr.hbm [resolvable:$true] %s214_s28 }
  0x15   :  { %140 = vmatpush.msra.mxu1 %v139_v2  ;;  %v137_v5 = vld [vmem:[#allocation7 + $0x68] sm:$0xff]  ;;  %v90_v6 = vld [vmem:[#allocation5] sm:$0xff]  ;;  %v88_v7 = vld [vmem:[#allocation2] sm:$0xff] }
  0x16   :  { %111 = vmatpush.msra.mxu0 %v92_v1  ;;  %v136_v8 = vld [vmem:[#allocation7 + $0x60] sm:$0xff]  ;;  %v135_v9 = vld [vmem:[#allocation7 + $0x58] sm:$0xff]  ;;  %v134_v10 = vld [vmem:[#allocation7 + $0x50] sm:$0xff] }
  0x17   :  { %141 = vmatpush.msra.mxu1 %v138_v4  ;;  %v133_v11 = vld [vmem:[#allocation7 + $0x48] sm:$0xff]  ;;  %v132_v12 = vld [vmem:[#allocation7 + $0x40] sm:$0xff]  ;;  %v131_v13 = vld [vmem:[#allocation7 + $0x38] sm:$0xff] }
  0x18   :  { %112 = vmatpush.msra.mxu0 %v91_v3  ;;  %v130_v14 = vld [vmem:[#allocation7 + $0x30] sm:$0xff]  ;;  %v129_v15 = vld [vmem:[#allocation7 + $0x28] sm:$0xff]  ;;  %v128_v16 = vld [vmem:[#allocation7 + $0x20] sm:$0xff] }
  0x19   :  { %142 = vmatpush.msra.mxu1 %v137_v5  ;;  %v127_v17 = vld [vmem:[#allocation7 + $0x18] sm:$0xff]  ;;  %v126_v18 = vld [vmem:[#allocation7 + $0x10] sm:$0xff]  ;;  %v125_v19 = vld [vmem:[#allocation7 + $0x8] sm:$0xff] }
  0x1a   :  { %113 = vmatpush.msra.mxu0 %v90_v6  ;;  %v124_v20 = vld [vmem:[#allocation7] sm:$0xff]  ;;  %v181_v21 = vld [vmem:[#allocation8 + $0x78] sm:$0xff]  ;;  %v180_v22 = vld [vmem:[#allocation8 + $0x70] sm:$0xff] }
  0x1b   :  { %226 = vmatmul.msk.f32.vlgmr.msra.gmra.mxu0 %vm94_vm0, %v88_v7  ;;  %143 = vmatpush.msra.mxu1 %v136_v8  ;;  %v179_v23 = vld [vmem:[#allocation8 + $0x68] sm:$0xff]  ;;  %v178_v24 = vld [vmem:[#allocation8 + $0x60] sm:$0xff]  ;;  %v177_v25 = vld [vmem:[#allocation8 + $0x58] sm:$0xff] }
  0x1c   :  { %182 = vmatpush.msra.mxu2 %v181_v21  ;;  %v176_v26 = vld [vmem:[#allocation8 + $0x50] sm:$0xff]  ;;  %v175_v27 = vld [vmem:[#allocation8 + $0x48] sm:$0xff]  ;;  %v174_v28 = vld [vmem:[#allocation8 + $0x40] sm:$0xff] }
  0x1d   :  { %144 = vmatpush.msra.mxu1 %v135_v9  ;;  %v173_v29 = vld [vmem:[#allocation8 + $0x38] sm:$0xff]  ;;  %v172_v30 = vld [vmem:[#allocation8 + $0x30] sm:$0xff]  ;;  %v171_v31 = vld [vmem:[#allocation8 + $0x28] sm:$0xff] }
  0x1e   :  { %183 = vmatpush.msra.mxu2 %v180_v22  ;;  %v170_v32 = vld [vmem:[#allocation8 + $0x20] sm:$0xff]  ;;  %v169_v33 = vld [vmem:[#allocation8 + $0x18] sm:$0xff]  ;;  %v168_v38 = vld [vmem:[#allocation8 + $0x10] sm:$0xff] }
  0x1f   :  { %145 = vmatpush.msra.mxu1 %v134_v10  ;;  %v234_v34 = vld [vmem:[%s440_s4] ss:$0 sm:$0xff]  ;;  %v167_v39 = vld [vmem:[#allocation8 + $0x8] sm:$0xff]  ;;  %v166_v40 = vld [vmem:[#allocation8] sm:$0xff] }
  0x20   :  { %184 = vmatpush.msra.mxu2 %v179_v23  ;;  %v235_v41 = vld [vmem:[%s441_s5] ss:$0 sm:$0xff] }
  0x21   :  { %146 = vmatpush.msra.mxu1 %v133_v11  ;;  %v236_v45 = vld [vmem:[%s442_s6] ss:$0 sm:$0xff] }
  0x22   :  { %185 = vmatpush.msra.mxu2 %v178_v24 }
  0x23   :  { %147 = vmatpush.msra.mxu1 %v132_v12 }
  0x24   :  { %186 = vmatpush.msra.mxu2 %v177_v25 }
  0x25   :  { %148 = vmatpush.msra.mxu1 %v131_v13 }
  0x26   :  { %187 = vmatpush.msra.mxu2 %v176_v26 }
  0x27   :  { %149 = vmatpush.msra.mxu1 %v130_v14 }
  0x28   :  { %188 = vmatpush.msra.mxu2 %v175_v27 }
  0x29   :  { %150 = vmatpush.msra.mxu1 %v129_v15 }
  0x2a   :  { %189 = vmatpush.msra.mxu2 %v174_v28 }
  0x2b   :  { %151 = vmatpush.msra.mxu1 %v128_v16 }
  0x2c   :  { %190 = vmatpush.msra.mxu2 %v173_v29 }
  0x2d   :  { %152 = vmatpush.msra.mxu1 %v127_v17 }
  0x2e   :  { %191 = vmatpush.msra.mxu2 %v172_v30 }
  0x2f   :  { %153 = vmatpush.msra.mxu1 %v126_v18 }
  0x30   :  { %192 = vmatpush.msra.mxu2 %v171_v31 }
  0x31   :  { %154 = vmatpush.msra.mxu1 %v125_v19 }
  0x32   :  { %193 = vmatpush.msra.mxu2 %v170_v32 }
  0x33   :  { %155 = vmatpush.msra.mxu1 %v124_v20 }
  0x34   :  { %194 = vmatpush.msra.mxu2 %v169_v33 }
  0x36   :  { %195 = vmatpush.msra.mxu2 %v168_v38 }
  0x38   :  { %196 = vmatpush.msra.mxu2 %v167_v39 }
  0x3a   :  { %197 = vmatpush.msra.mxu2 %v166_v40 }
  0x98   :  { %v115_v35 = vpop.f32.mrf.mxu0 }
  0x99   :  { %v121_v36 = vadd.f32 %v234_v34, %v115_v35 }
  0x9b   :  { %v122_v37 = vmax.f32 %v121_v36, 0.0 }
  0x9d   :  { %156 = vmatmul.f32.vlgmr.msra.gmra.mxu1 %v122_v37 }
 0x11a   :  { %v157_v42 = vpop.f32.mrf.mxu1 }
 0x11b   :  { %v163_v43 = vadd.f32 %v235_v41, %v157_v42 }
 0x11d   :  { %v164_v44 = vmax.f32 %v163_v43, 0.0 }
 0x11f   :  { %198 = vmatmul.f32.vlgmr.msra.gmra.mxu2 %v164_v44 }
 0x1a2   :  { %v199_v46 = vpop.f32.mrf.mxu2 }
 0x1a3   :  { %v205_v47 = vadd.f32 %v236_v45, %v199_v46 }
 0x1a5   :  { %206 = vst [vmem:[#allocation10] sm:$0xff] %v205_v47 }
 0x1a6   :  { %217 = dma.vmem_to_hbm [thread:$0]  %s213_s25, 128, %s215_s28, [#allocation4]  }
 0x1a7   :  { %363 = dma.done.wait [#allocation4], 128  }
 0x1a8   :  { %364 = vsyncadd [#allocation4], 4294967168 }
 0x1a9   :  { %222 = vsyncpa [#allocation3], 1 }
 0x1aa   :  { %223 = vsyncpa [#allocation6], 1 }
 0x1ab   :  { %224 = vsyncpa [#allocation9], 1 }
 0x1ac   :  { %225 = vsyncpa [#allocation4], 1 }

</bundles_post_ra>
